<compile_context>
chip_gen: v6e
topology: v6e:2x2x1
jax: 0.10.0
libtpu: 0.0.40
codegen_flags: <defaults>
</compile_context>

<pallas_src>
import functools

import jax
import jax.numpy as jnp
from jax.experimental import pallas as pl
from jax.experimental.pallas import tpu as pltpu


HIDDEN_DIM = 128
NEG_SLOPE = 0.01  # PyTorch F.leaky_relu default


def _leaky_relu(x):
    return jnp.where(x > 0, x, NEG_SLOPE * x)


def _round_up(x, m):
    return ((x + m - 1) // m) * m


def _make_cvae_kernel(n_in, out_dim, compute_dtype):
    """Kernel factory closed over the (static) number of concatenated inputs."""

    def kernel(*refs):
        xs = refs[:n_in]                       # n_in x (TB, d_i)
        w1s = refs[n_in:2 * n_in]              # n_in x (d_i, 128)
        b1, w2, b2, wh, bh, noise = refs[2 * n_in:2 * n_in + 6]
        out = refs[2 * n_in + 6]               # (TB, 3*D)  packed [z|mu|logvar]

        cd = compute_dtype

        # ---- mlp1 (split over the original concat) + leaky_relu ----------
        acc = jnp.dot(xs[0][...].astype(cd), w1s[0][...],
                      preferred_element_type=jnp.float32)
        for i in range(1, n_in):
            acc = acc + jnp.dot(xs[i][...].astype(cd), w1s[i][...],
                                preferred_element_type=jnp.float32)
        h = _leaky_relu(acc + b1[...])

        # ---- mlp2 + leaky_relu ------------------------------------------
        h = jnp.dot(h.astype(cd), w2[...],
                    preferred_element_type=jnp.float32) + b2[...]
        h = _leaky_relu(h)

        # ---- fused (mlp3 folded) heads: one wide matmul -> [mu | logvar] -
        head = jnp.dot(h.astype(cd), wh[...],
                       preferred_element_type=jnp.float32) + bh[...]
        mu = head[:, :out_dim]
        logvar = head[:, out_dim:]

        # ---- reparameterization ------------------------------------------
        z = mu + jnp.exp(logvar * 0.5) * noise[...]

        # Packed lane-dense output: [z | mu | logvar]
        out[:, :out_dim] = z.astype(out.dtype)
        out[:, out_dim:] = head.astype(out.dtype)

    return kernel


def cvae_encoder_forward(inputs, params, noise, *,
                         compute_dtype=jnp.float32, tb=None):
    """inputs: list of [B, d_i] arrays (concatenated on last axis in torch).

    compute_dtype: dtype fed to the MXU (use jnp.bfloat16 on v6e/v7x for the
    native-bf16 MXU; accumulation and all elementwise math stay f32).
    """
    n_in = len(inputs)
    B = inputs[0].shape[0]
    D = params["w2"].shape[1]  # output_dim
    hi = jax.lax.Precision.HIGHEST

    # --- Fold mlp3 into the heads (exact up to fp reassociation) ----------
    #   mu = (h@W3 + b3)@Wmu + bmu = h@(W3@Wmu) + (b3@Wmu + bmu)
    w_head = jnp.concatenate(
        [jnp.dot(params["w3"], params["wmu"], precision=hi),
         jnp.dot(params["w3"], params["wlv"], precision=hi)], axis=-1)
    b_head = jnp.concatenate(
        [jnp.dot(params["b3"], params["wmu"], precision=hi) + params["bmu"],
         jnp.dot(params["b3"], params["wlv"], precision=hi) + params["blv"]],
        axis=-1)

    # --- Split W1 per input chunk (avoids materializing cat(inputs)) ------
    w1_parts = []
    off = 0
    for x in inputs:
        d = x.shape[-1]
        w1_parts.append(params["w1"][off:off + d, :].astype(compute_dtype))
        off += d
    w2 = params["w2"].astype(compute_dtype)
    w_head = w_head.astype(compute_dtype)

    # --- Batch tiling: big enough to amortize per-step overhead, small
    #     enough to fit v7x's 64 MiB VMEM / 32 MiB scoped default easily.
    if tb is None:
        tb = max(8, min(512, _round_up(B, 8)))
    grid = (pl.cdiv(B, tb),)

    row_spec = lambda feat: pl.BlockSpec((tb, feat), lambda i: (i, 0))
    res_spec = lambda shape: pl.BlockSpec(shape, lambda i: (0,) * len(shape))

    operands = (
        *inputs,
        *w1_parts,
        params["b1"], w2, params["b2"], w_head, b_head,
        noise,
    )
    in_specs = (
        [row_spec(x.shape[-1]) for x in inputs]
        + [res_spec(w.shape) for w in w1_parts]
        + [res_spec(params["b1"].shape), res_spec(w2.shape),
           res_spec(params["b2"].shape), res_spec(w_head.shape),
           res_spec(b_head.shape), row_spec(D)]
    )

    packed = pl.pallas_call(
        _make_cvae_kernel(n_in, D, compute_dtype),
        out_shape=jax.ShapeDtypeStruct((B, 3 * D), jnp.float32),
        grid=grid,
        in_specs=in_specs,
        out_specs=row_spec(3 * D),
        compiler_params=pltpu.CompilerParams(
            dimension_semantics=("parallel",)),  # megacore sharding on v7x
    )(*operands)

    z = packed[:, :D]
    mu = packed[:, D:2 * D]
    logvar = packed[:, 2 * D:]
    return z, mu, logvar


def init_params(key, input_dim, output_dim):
    """Deterministic init. Weights stored as [in, out] so kernel does x @ W + b.
    (Matches nn.Linear semantics y = x W^T + b with W_torch = W.T.)"""
    def linear(k, fan_in, fan_out):
        kw, kb = jax.random.split(k)
        bound = 1.0 / jnp.sqrt(fan_in)
        w = jax.random.uniform(kw, (fan_in, fan_out), jnp.float32, -bound, bound)
        b = jax.random.uniform(kb, (1, fan_out), jnp.float32, -bound, bound)
        return w, b

    keys = jax.random.split(key, 5)
    w1, b1 = linear(keys[0], input_dim, HIDDEN_DIM)
    w2, b2 = linear(keys[1], HIDDEN_DIM, output_dim)
    w3, b3 = linear(keys[2], output_dim, output_dim)
    wmu, bmu = linear(keys[3], output_dim, output_dim)
    wlv, blv = linear(keys[4], output_dim, output_dim)
    return dict(w1=w1, b1=b1, w2=w2, b2=b2, w3=w3, b3=b3,
                wmu=wmu, bmu=bmu, wlv=wlv, blv=blv)


if __name__ == "__main__":
    key = jax.random.PRNGKey(0)
    k_in1, k_in2, k_par, k_noise = jax.random.split(key, 4)

    batch = 8
    # two conditioning inputs concatenated on the last dim -> input_dim = 32
    in1 = jax.random.normal(k_in1, (batch, 16), jnp.float32)
    in2 = jax.random.normal(k_in2, (batch, 16), jnp.float32)
    input_dim = in1.shape[-1] + in2.shape[-1]
    output_dim = 32

    params = init_params(k_par, input_dim, output_dim)
    # TODO(synk): torch.randn is generated inside forward(); here noise is an
    # explicit input for determinism (could use pltpu.prng_* in-kernel).
    noise = jax.random.normal(k_noise, (batch, output_dim), jnp.float32)

    z, mu, logvar = cvae_encoder_forward([in1, in2], params, noise)
    jax.block_until_ready((z, mu, logvar))

    # Pure-JAX reference check (unfolded, matches the PyTorch graph)
    x = jnp.concatenate([in1, in2], axis=-1)
    h = jax.nn.leaky_relu(x @ params["w1"] + params["b1"], NEG_SLOPE)
    h = jax.nn.leaky_relu(h @ params["w2"] + params["b2"], NEG_SLOPE)
    h = h @ params["w3"] + params["b3"]
    mu_ref = h @ params["wmu"] + params["bmu"]
    lv_ref = h @ params["wlv"] + params["blv"]
    z_ref = mu_ref + jnp.exp(lv_ref * 0.5) * noise

    assert jnp.allclose(mu, mu_ref, atol=5e-5), "mu mismatch"
    assert jnp.allclose(logvar, lv_ref, atol=5e-5), "logvar mismatch"
    assert jnp.allclose(z, z_ref, atol=5e-5), "z mismatch"

    print("KERNEL_OK")
</pallas_src>

<mosaic_0001>
module attributes {stable_mosaic.version = 11 : i64} {
  func.func @kernel(%arg0: i32, %arg1: memref<8x16xf32, #tpu.memory_space<vmem>>, %arg2: memref<8x16xf32, #tpu.memory_space<vmem>>, %arg3: memref<16x128xf32, #tpu.memory_space<vmem>>, %arg4: memref<16x128xf32, #tpu.memory_space<vmem>>, %arg5: memref<1x128xf32, #tpu.memory_space<vmem>>, %arg6: memref<128x32xf32, #tpu.memory_space<vmem>>, %arg7: memref<1x32xf32, #tpu.memory_space<vmem>>, %arg8: memref<32x64xf32, #tpu.memory_space<vmem>>, %arg9: memref<1x64xf32, #tpu.memory_space<vmem>>, %arg10: memref<8x32xf32, #tpu.memory_space<vmem>>, %arg11: memref<8x96xf32, #tpu.memory_space<vmem>>) attributes {dimension_semantics = [#tpu.dimension_semantics<parallel>], iteration_bounds = array<i64: 1>, scalar_prefetch = 0 : i64, scratch_operands = 0 : i64, tpu.core_type = #tpu.core_type<tc>, window_params = [{transform_indices = @transform_0, window_bounds = array<i64: 8, 16>}, {transform_indices = @transform_1, window_bounds = array<i64: 8, 16>}, {pipeline_mode = #tpu.pipeline_mode<synchronous>, transform_indices = @transform_2, window_bounds = array<i64: 16, 128>}, {pipeline_mode = #tpu.pipeline_mode<synchronous>, transform_indices = @transform_3, window_bounds = array<i64: 16, 128>}, {pipeline_mode = #tpu.pipeline_mode<synchronous>, transform_indices = @transform_4, window_bounds = array<i64: 1, 128>}, {pipeline_mode = #tpu.pipeline_mode<synchronous>, transform_indices = @transform_5, window_bounds = array<i64: 128, 32>}, {pipeline_mode = #tpu.pipeline_mode<synchronous>, transform_indices = @transform_6, window_bounds = array<i64: 1, 32>}, {pipeline_mode = #tpu.pipeline_mode<synchronous>, transform_indices = @transform_7, window_bounds = array<i64: 32, 64>}, {pipeline_mode = #tpu.pipeline_mode<synchronous>, transform_indices = @transform_8, window_bounds = array<i64: 1, 64>}, {transform_indices = @transform_9, window_bounds = array<i64: 8, 32>}, {transform_indices = @transform_10, window_bounds = array<i64: 8, 96>}]} {
    %c0 = arith.constant 0 : index
    %c0_0 = arith.constant 0 : index
    %0 = vector.load %arg1[%c0, %c0_0] : memref<8x16xf32, #tpu.memory_space<vmem>>, vector<8x16xf32>
    %c0_1 = arith.constant 0 : index
    %c0_2 = arith.constant 0 : index
    %1 = vector.load %arg3[%c0_1, %c0_2] : memref<16x128xf32, #tpu.memory_space<vmem>>, vector<16x128xf32>
    %cst = arith.constant dense<0.000000e+00> : vector<8x128xf32>
    %2 = tpu.matmul %0, %1, %cst {dimension_numbers = #tpu.dot_dimension_numbers<[1], [0], [0], [1], [0, 0, 1, 1], [], []>} : vector<8x16xf32>, vector<16x128xf32>, vector<8x128xf32> -> vector<8x128xf32>
    %c0_3 = arith.constant 0 : index
    %c0_4 = arith.constant 0 : index
    %3 = vector.load %arg2[%c0_3, %c0_4] : memref<8x16xf32, #tpu.memory_space<vmem>>, vector<8x16xf32>
    %c0_5 = arith.constant 0 : index
    %c0_6 = arith.constant 0 : index
    %4 = vector.load %arg4[%c0_5, %c0_6] : memref<16x128xf32, #tpu.memory_space<vmem>>, vector<16x128xf32>
    %cst_7 = arith.constant dense<0.000000e+00> : vector<8x128xf32>
    %5 = tpu.matmul %3, %4, %cst_7 {dimension_numbers = #tpu.dot_dimension_numbers<[1], [0], [0], [1], [0, 0, 1, 1], [], []>} : vector<8x16xf32>, vector<16x128xf32>, vector<8x128xf32> -> vector<8x128xf32>
    %6 = arith.addf %2, %5 : vector<8x128xf32>
    %c0_8 = arith.constant 0 : index
    %c0_9 = arith.constant 0 : index
    %7 = vector.load %arg5[%c0_8, %c0_9] : memref<1x128xf32, #tpu.memory_space<vmem>>, vector<1x128xf32>
    %8 = vector.broadcast %7 : vector<1x128xf32> to vector<8x128xf32>
    %9 = arith.addf %6, %8 : vector<8x128xf32>
    %cst_10 = arith.constant 0.000000e+00 : f32
    %10 = vector.broadcast %cst_10 : f32 to vector<8x128xf32>
    %11 = arith.cmpf ogt, %9, %10 : vector<8x128xf32>
    %cst_11 = arith.constant 0.00999999977 : f32
    %12 = vector.broadcast %cst_11 : f32 to vector<8x128xf32>
    %13 = arith.mulf %12, %9 : vector<8x128xf32>
    %14 = arith.select %11, %9, %13 : vector<8x128xi1>, vector<8x128xf32>
    %c0_12 = arith.constant 0 : index
    %c0_13 = arith.constant 0 : index
    %15 = vector.load %arg6[%c0_12, %c0_13] : memref<128x32xf32, #tpu.memory_space<vmem>>, vector<128x32xf32>
    %cst_14 = arith.constant dense<0.000000e+00> : vector<8x32xf32>
    %16 = tpu.matmul %14, %15, %cst_14 {dimension_numbers = #tpu.dot_dimension_numbers<[1], [0], [0], [1], [0, 0, 1, 1], [], []>} : vector<8x128xf32>, vector<128x32xf32>, vector<8x32xf32> -> vector<8x32xf32>
    %c0_15 = arith.constant 0 : index
    %c0_16 = arith.constant 0 : index
    %17 = vector.load %arg7[%c0_15, %c0_16] : memref<1x32xf32, #tpu.memory_space<vmem>>, vector<1x32xf32>
    %18 = vector.broadcast %17 : vector<1x32xf32> to vector<8x32xf32>
    %19 = arith.addf %16, %18 : vector<8x32xf32>
    %cst_17 = arith.constant 0.000000e+00 : f32
    %20 = vector.broadcast %cst_17 : f32 to vector<8x32xf32>
    %21 = arith.cmpf ogt, %19, %20 : vector<8x32xf32>
    %cst_18 = arith.constant 0.00999999977 : f32
    %22 = vector.broadcast %cst_18 : f32 to vector<8x32xf32>
    %23 = arith.mulf %22, %19 : vector<8x32xf32>
    %24 = arith.select %21, %19, %23 : vector<8x32xi1>, vector<8x32xf32>
    %c0_19 = arith.constant 0 : index
    %c0_20 = arith.constant 0 : index
    %25 = vector.load %arg8[%c0_19, %c0_20] : memref<32x64xf32, #tpu.memory_space<vmem>>, vector<32x64xf32>
    %cst_21 = arith.constant dense<0.000000e+00> : vector<8x64xf32>
    %26 = tpu.matmul %24, %25, %cst_21 {dimension_numbers = #tpu.dot_dimension_numbers<[1], [0], [0], [1], [0, 0, 1, 1], [], []>} : vector<8x32xf32>, vector<32x64xf32>, vector<8x64xf32> -> vector<8x64xf32>
    %c0_22 = arith.constant 0 : index
    %c0_23 = arith.constant 0 : index
    %27 = vector.load %arg9[%c0_22, %c0_23] : memref<1x64xf32, #tpu.memory_space<vmem>>, vector<1x64xf32>
    %28 = vector.broadcast %27 : vector<1x64xf32> to vector<8x64xf32>
    %29 = arith.addf %26, %28 : vector<8x64xf32>
    %30 = vector.extract_strided_slice %29 {offsets = [0, 0], sizes = [8, 32], strides = [1, 1]} : vector<8x64xf32> to vector<8x32xf32>
    %31 = vector.extract_strided_slice %29 {offsets = [0, 32], sizes = [8, 32], strides = [1, 1]} : vector<8x64xf32> to vector<8x32xf32>
    %cst_24 = arith.constant 5.000000e-01 : f32
    %32 = vector.broadcast %cst_24 : f32 to vector<8x32xf32>
    %33 = arith.mulf %31, %32 : vector<8x32xf32>
    %34 = math.exp %33 : vector<8x32xf32>
    %c0_25 = arith.constant 0 : index
    %c0_26 = arith.constant 0 : index
    %35 = vector.load %arg10[%c0_25, %c0_26] : memref<8x32xf32, #tpu.memory_space<vmem>>, vector<8x32xf32>
    %36 = arith.mulf %34, %35 : vector<8x32xf32>
    %37 = arith.addf %30, %36 : vector<8x32xf32>
    %c0_27 = arith.constant 0 : index
    %c0_28 = arith.constant 0 : index
    %38 = vector.load %arg11[%c0_27, %c0_28] : memref<8x96xf32, #tpu.memory_space<vmem>>, vector<8x32xf32>
    tpu.vector_store %arg11[%c0_27, %c0_28], %37 {strides = array<i32>} : memref<8x96xf32, #tpu.memory_space<vmem>>, vector<8x32xf32>,
    %c0_29 = arith.constant 0 : index
    %c32 = arith.constant 32 : index
    %39 = vector.load %arg11[%c0_29, %c32] : memref<8x96xf32, #tpu.memory_space<vmem>>, vector<8x64xf32>
    tpu.vector_store %arg11[%c0_29, %c32], %29 {strides = array<i32>} : memref<8x96xf32, #tpu.memory_space<vmem>>, vector<8x64xf32>,
    return
  }
  func.func @transform_0(%arg0: i32) -> (i32, i32) {
    %c0_i32 = arith.constant 0 : i32
    %c0_i32_0 = arith.constant 0 : i32
    return %arg0, %c0_i32 : i32, i32
  }
  func.func @transform_1(%arg0: i32) -> (i32, i32) {
    %c0_i32 = arith.constant 0 : i32
    %c0_i32_0 = arith.constant 0 : i32
    return %arg0, %c0_i32 : i32, i32
  }
  func.func @transform_2(%arg0: i32) -> (i32, i32) {
    %c0_i32 = arith.constant 0 : i32
    %c0_i32_0 = arith.constant 0 : i32
    %c0_i32_1 = arith.constant 0 : i32
    return %c0_i32, %c0_i32_0 : i32, i32
  }
  func.func @transform_3(%arg0: i32) -> (i32, i32) {
    %c0_i32 = arith.constant 0 : i32
    %c0_i32_0 = arith.constant 0 : i32
    %c0_i32_1 = arith.constant 0 : i32
    return %c0_i32, %c0_i32_0 : i32, i32
  }
  func.func @transform_4(%arg0: i32) -> (i32, i32) {
    %c0_i32 = arith.constant 0 : i32
    %c0_i32_0 = arith.constant 0 : i32
    %c0_i32_1 = arith.constant 0 : i32
    return %c0_i32, %c0_i32_0 : i32, i32
  }
  func.func @transform_5(%arg0: i32) -> (i32, i32) {
    %c0_i32 = arith.constant 0 : i32
    %c0_i32_0 = arith.constant 0 : i32
    %c0_i32_1 = arith.constant 0 : i32
    return %c0_i32, %c0_i32_0 : i32, i32
  }
  func.func @transform_6(%arg0: i32) -> (i32, i32) {
    %c0_i32 = arith.constant 0 : i32
    %c0_i32_0 = arith.constant 0 : i32
    %c0_i32_1 = arith.constant 0 : i32
    return %c0_i32, %c0_i32_0 : i32, i32
  }
  func.func @transform_7(%arg0: i32) -> (i32, i32) {
    %c0_i32 = arith.constant 0 : i32
    %c0_i32_0 = arith.constant 0 : i32
    %c0_i32_1 = arith.constant 0 : i32
    return %c0_i32, %c0_i32_0 : i32, i32
  }
  func.func @transform_8(%arg0: i32) -> (i32, i32) {
    %c0_i32 = arith.constant 0 : i32
    %c0_i32_0 = arith.constant 0 : i32
    %c0_i32_1 = arith.constant 0 : i32
    return %c0_i32, %c0_i32_0 : i32, i32
  }
  func.func @transform_9(%arg0: i32) -> (i32, i32) {
    %c0_i32 = arith.constant 0 : i32
    %c0_i32_0 = arith.constant 0 : i32
    return %arg0, %c0_i32 : i32, i32
  }
  func.func @transform_10(%arg0: i32) -> (i32, i32) {
    %c0_i32 = arith.constant 0 : i32
    %c0_i32_0 = arith.constant 0 : i32
    return %arg0, %c0_i32 : i32, i32
  }
}

</mosaic_0001>

<bundles_post_ra>
// kernel: tpu_custom_call.1
= control target key start
LH: loop header
LB: loop body
LE: loop exit
PB: predicated region body
PF: predicated region fallthrough
CT: control target
= control target key end

     0   :  { %v539_v1 = vmov 0.0   ;;  %vm540_vm0 = vmmov 0   ;;  %vm42_vm1 = vcmask 130048   ;;  %s728_s0 = inlined_call_operand.vmem [shape: f32[8,16], index: 0, kind: input, shape index: {}]   ;;  %s729_s1 = inlined_call_operand.vmem [shape: f32[8,16], index: 1, kind: input, shape index: {}]   ;;  %s730_s2 = inlined_call_operand.vmem [shape: f32[16,128], index: 2, kind: input, shape index: {}]   ;;  %s731_s3 = inlined_call_operand.vmem [shape: f32[16,128], index: 3, kind: input, shape index: {}]   ;;  %s732_s4 = inlined_call_operand.vmem [shape: f32[1,128], index: 4, kind: input, shape index: {}]   ;;  %s733_s5 = inlined_call_operand.vmem [shape: f32[128,32], index: 5, kind: input, shape index: {}]   ;;  %s734_s6 = inlined_call_operand.vmem [shape: f32[1,32], index: 6, kind: input, shape index: {}]   ;;  %s735_s7 = inlined_call_operand.vmem [shape: f32[32,64], index: 7, kind: input, shape index: {}]   ;;  %s736_s8 = inlined_call_operand.vmem [shape: f32[1,64], index: 8, kind: input, shape index: {}]   ;;  %s737_s9 = inlined_call_operand.vmem [shape: f32[8,32], index: 9, kind: input, shape index: {}]   ;;  %s738_s10 = inlined_call_operand.hbm [shape: f32[8,96], index: 10, kind: output, shape index: {}]  }
   0x1   :  { %v41_v0 = vld [vmem:[%s731_s3 + $0x8] sm:$0xff]  ;;  %450 = vmatprep.subr.mxu1 %v539_v1  ;;  %v40_v2 = vld [vmem:[%s731_s3] sm:$0xff]  ;;  %454 = vmatprep.mubr.msk.f32.mxu1 %vm540_vm0, %v539_v1  ;;  %v215_v4 = vld [vmem:[%s733_s5 + $0x78] sm:$0xff] }
   0x2   :  { %451 = vmatpush3.msra.mxu1 %v41_v0  ;;  %v39_v3 = vld [vmem:[%s729_s1] sm:$0xff]  ;;  %464 = vmatprep.subr.mxu0 %v539_v1  ;;  %v38_v5 = vld [vmem:[%s730_s2 + $0x8] sm:$0xff]  ;;  %v214_v6 = vld [vmem:[%s733_s5 + $0x70] sm:$0xff] }
   0x3   :  { %452 = vmatprep.subr.mxu1 %v539_v1  ;;  %465 = vmatpush3.msra.mxu0 %v215_v4  ;;  %v37_v7 = vld [vmem:[%s730_s2] sm:$0xff] }
   0x4   :  { %453 = vmatpush3.msra.mxu1 %v40_v2  ;;  %466 = vmatprep.subr.mxu0 %v539_v1 }
   0x5   :  { %455 = vmatmul.mubr.msk.f32.vlgmr.msra.gmra.mxu1 %vm42_vm1, %v39_v3  ;;  %457 = vmatprep.subr.mxu1 %v539_v1 }
   0x6   :  { %15 = vsyncpa [#allocation3], 0  ;;  %458 = vmatpush3.msra.mxu1 %v38_v5  ;;  %461 = vmatprep.mubr.msk.f32.mxu1 %vm540_vm0, %v539_v1  ;;  %v36_v8 = vld [vmem:[%s728_s0] sm:$0xff]  ;;  %v213_v9 = vld [vmem:[%s733_s5 + $0x68] sm:$0xff]  ;;  %s541_s19 = smov 32   ;;  %vm307_vm4 = vcmask 261120  }
   0x7   :  { %459 = vmatprep.subr.mxu1 %v539_v1  ;;  %467 = vmatpush3.msra.mxu0 %v214_v6  ;;  %v212_v10 = vld [vmem:[%s733_s5 + $0x60] sm:$0xff]  ;;  %v211_v11 = vld [vmem:[%s733_s5 + $0x58] sm:$0xff]  ;;  %v210_v12 = vld [vmem:[%s733_s5 + $0x50] sm:$0xff]  ;;  %vm400_vm5 = vcmask 785664  }
   0x8   :  { %460 = vmatpush3.msra.mxu1 %v37_v7  ;;  %468 = vmatprep.subr.mxu0 %v539_v1  ;;  %v209_v13 = vld [vmem:[%s733_s5 + $0x48] sm:$0xff]  ;;  %v208_v14 = vld [vmem:[%s733_s5 + $0x40] sm:$0xff]  ;;  %v207_v15 = vld [vmem:[%s733_s5 + $0x38] sm:$0xff] }
   0x9   :  { %462 = vmatmul.mubr.msk.f32.vlgmr.msra.gmra.mxu1 %vm42_vm1, %v36_v8  ;;  %469 = vmatpush3.msra.mxu0 %v213_v9  ;;  %v206_v16 = vld [vmem:[%s733_s5 + $0x30] sm:$0xff]  ;;  %v205_v17 = vld [vmem:[%s733_s5 + $0x28] sm:$0xff]  ;;  %v204_v18 = vld [vmem:[%s733_s5 + $0x20] sm:$0xff] }
   0xa   :  { %470 = vmatprep.subr.mxu0 %v539_v1  ;;  %496 = vmatprep.mubr.msk.f32.mxu0 %vm540_vm0, %v539_v1  ;;  %v203_v19 = vld [vmem:[%s733_s5 + $0x18] sm:$0xff]  ;;  %v202_v20 = vld [vmem:[%s733_s5 + $0x10] sm:$0xff]  ;;  %v201_v21 = vld [vmem:[%s733_s5 + $0x8] sm:$0xff] }
   0xb   :  { %471 = vmatpush3.msra.mxu0 %v212_v10  ;;  %499 = vmatprep.subr.mxu1 %v539_v1  ;;  %v200_v22 = vld [vmem:[%s733_s5] sm:$0xff]  ;;  %v299_v23 = vld [vmem:[%s735_s7 + $0x18] sm:$0xff]  ;;  %v298_v33 = vld [vmem:[%s735_s7 + $0x10] sm:$0xff] }
   0xc   :  { %472 = vmatprep.subr.mxu0 %v539_v1  ;;  %507 = vmatprep.mubr.msk.f32.mxu1 %vm540_vm0, %v539_v1  ;;  %v418_v27 = vld [vmem:[%s732_s4] ss:$0 sm:$0xff]  ;;  %v297_v34 = vld [vmem:[%s735_s7 + $0x8] sm:$0xff] }
   0xd   :  { %473 = vmatpush3.msra.mxu0 %v211_v11  ;;  %500 = vmatpush3.msra.mxu1 %v299_v23  ;;  %v296_v35 = vld [vmem:[%s735_s7] sm:$0xff] }
   0xe   :  { %474 = vmatprep.subr.mxu0 %v539_v1  ;;  %501 = vmatprep.subr.mxu1 %v539_v1  ;;  %v384_v36 = vld [vmem:[%s737_s9] sm:$0xff]  ;;  %s543_s9 = smov [#allocation2]  }
   0xf   :  { %475 = vmatpush3.msra.mxu0 %v210_v12  ;;  %502 = vmatpush3.msra.mxu1 %v298_v33  ;;  %v419_v37 = vld [vmem:[%s734_s6] ss:$0 sm:$0xff]  ;;  %s542_s6 = smov 96   ;;  %s408_s22 = sshll.u32 %s543_s9, 4  ;;  %s409_s22 = int_to_ptr.vmem [resolvable:$true] %s408_s22 }
  0x10   :  { %476 = vmatprep.subr.mxu0 %v539_v1  ;;  %503 = vmatprep.subr.mxu1 %v539_v1  ;;  %v420_v43 = vld [vmem:[%s736_s8] ss:$0 sm:$0xff]  ;;  %s517_s8 = scalar_lea.vmem %s409_s22, 128  ;;  %p522_p1 = scmp.lt.s32.totalorder %s409_s22, %s409_s22 }
  0x11   :  { %477 = vmatpush3.msra.mxu0 %v209_v13  ;;  %504 = vmatpush3.msra.mxu1 %v297_v34  ;;  %p518_p0 = scmp.ne.s32.totalorder %s409_s22, %s517_s8  ;;  %p523_p2 = scmp.lt.s32.totalorder %s517_s8, %s517_s8 }
  0x12   :  { %478 = vmatprep.subr.mxu0 %v539_v1  ;;  %505 = vmatprep.subr.mxu1 %v539_v1 }
  0x13   :  { %479 = vmatpush3.msra.mxu0 %v208_v14  ;;  %506 = vmatpush3.msra.mxu1 %v296_v35  ;;  %p524_p3 = por %p523_p2, %p522_p1 }
  0x14   :  { %480 = vmatprep.subr.mxu0 %v539_v1  ;;  %386 = vrot.lane.b32.xlu0 %v384_v36, %s541_s19 }
  0x15   :  { %481 = vmatpush3.msra.mxu0 %v207_v15  ;;  %p525_p4 = pnand %p524_p3, %p518_p0 }
  0x16   :  { %482 = vmatprep.subr.mxu0 %v539_v1 }
  0x17   :  { %483 = vmatpush3.msra.mxu0 %v206_v16 }
  0x18   :  { %484 = vmatprep.subr.mxu0 %v539_v1 }
  0x19   :  { %485 = vmatpush3.msra.mxu0 %v205_v17 }
  0x1a   :  { %486 = vmatprep.subr.mxu0 %v539_v1 }
  0x1b   :  { %487 = vmatpush3.msra.mxu0 %v204_v18 }
  0x1c   :  { %488 = vmatprep.subr.mxu0 %v539_v1 }
  0x1d   :  { %489 = vmatpush3.msra.mxu0 %v203_v19 }
  0x1e   :  { %490 = vmatprep.subr.mxu0 %v539_v1 }
  0x1f   :  { %491 = vmatpush3.msra.mxu0 %v202_v20 }
  0x20   :  { %492 = vmatprep.subr.mxu0 %v539_v1 }
  0x21   :  { %493 = vmatpush3.msra.mxu0 %v201_v21 }
  0x22   :  { %494 = vmatprep.subr.mxu0 %v539_v1 }
  0x23   :  { %495 = vmatpush3.msra.mxu0 %v200_v22 }
  0x86   :  { %v387_v49 = vpop.permute.xlu0 %386 }
  0xc5   :  { %v112_v24 = vpop.f32.mrf.mxu1 }
  0xc7   :  { %v456_v25 = vpop.f32.mrf.mxu1 }
  0xc9   :  { %v185_v26 = vpop.f32.mrf.mxu1 }
  0xca   :  { %v186_v28 = vadd.f32 %v185_v26, %v112_v24 }
  0xcb   :  { %v463_v29 = vpop.f32.mrf.mxu1 }
  0xcc   :  { %v196_v30 = vadd.f32 %v418_v27, %v186_v28 }
  0xce   :  { %vm197_vm2 = vcmp.gt.f32.partialorder %v196_v30, 0.0  ;;  %v198_v31 = vmul.f32 0.01, %v196_v30 }
  0xd0   :  { %v199_v32 = vsel %vm197_vm2, %v196_v30, %v198_v31 }
  0xd1   :  { %497 = vmatmul.mubr.f32.vlgmr.msra.gmra.mxu0 %v199_v32 }
 0x191   :  { %v289_v38 = vpop.f32.mrf.mxu0 }
 0x192   :  { %v290_v39 = vadd.f32 %v419_v37, %v289_v38 }
 0x193   :  { %v498_v40 = vpop.f32.mrf.mxu0 }
 0x194   :  { %vm293_vm3 = vcmp.gt.f32.partialorder %v290_v39, 0.0  ;;  %v294_v41 = vmul.f32 0.01, %v290_v39 }
 0x196   :  { %v295_v42 = vsel %vm293_vm3, %v290_v39, %v294_v41 }
 0x197   :  { %508 = vmatmul.mubr.msk.f32.vlgmr.msra.gmra.mxu1 %vm307_vm4, %v295_v42 }
 0x257   :  { %v377_v44 = vpop.f32.mrf.mxu1 }
 0x258   :  { %v378_v45 = vadd.f32 %v420_v43, %v377_v44 }
 0x259   :  { %v509_v46 = vpop.f32.mrf.mxu1 }
 0x25a   :  { %v381_v47 = vmul.f32 0.5, %v378_v45  ;;  %397 = vrot.lane.b32.xlu1 %v378_v45, %s541_s19 }
 0x25c   :  { %v382_v48 = vmul.f32 1.442695, %v381_v47 }
 0x25e   :  { %515 = vpow2.f32 %v382_v48 }
 0x26b   :  { %v516_v50 = vpop.eup %515 }
 0x26c   :  { %v389_v51 = vmul.f32 %v516_v50, %v387_v49 }
 0x26e   :  { %391 = vrot.lane.b32.xlu0 %v389_v51, %s542_s6 }
 0x2cc   :  { %v398_v54 = vpop.permute.xlu1 %397 }
 0x2e0   :  { %v392_v52 = vpop.permute.xlu0 %391 }
 0x2e1   :  { %v394_v53 = vadd.f32 %v392_v52, %v378_v45 }
 0x2e3   :  { %395 = vst.msk [vmem:[#allocation2] sm:$0xff] %vm307_vm4, %v394_v53 }
 0x2e4   :  { %401 = vst.msk [vmem:[#allocation2] sm:$0xff] %vm400_vm5, %v398_v54 }
 0x2e5   :  { %528 = shalt.err (!%p525_p4)
}
 0x2e6   :  { %411 = dma.vmem_to_hbm [thread:$0]  %s409_s22, 128, %s738_s10, [#allocation3]  }
 0x2e7   :  { %537 = dma.done.wait [#allocation3], 128  }
 0x2e8   :  { %538 = vsyncadd [#allocation3], 4294967168 }
 0x2e9   :  { %415 = vsyncpa [#allocation3], 1 }

</bundles_post_ra>
